<compile_context>
chip_gen: v7x
topology: tpu7x:2x2x1
jax: 0.10.0
libtpu: 0.0.40
codegen_flags: <defaults>
</compile_context>

<pallas_src>
import functools

import jax
import jax.numpy as jnp
from jax import lax
from jax.experimental import pallas as pl
from jax.experimental.pallas import tpu as pltpu

_LANES = 128


def _out_conv_kernel(x_ref, w_ref, b_ref, o_ref, *, cin, cout, rs):
    # x_ref: VMEM (1, cin, R, 128)   o_ref: VMEM (1, cout, R, 128)
    # w_ref: SMEM (cout, cin)        b_ref: SMEM (cout,)
    n_strips = x_ref.shape[2] // rs  # static; rs divides R by construction

    def strip(s, carry):
        r0 = pl.multiple_of(s * rs, rs)
        rows = pl.ds(r0, rs)
        for o in range(cout):                     # statically unrolled mix
            acc = x_ref[0, 0, rows, :].astype(jnp.float32) * w_ref[o, 0]
            for c in range(1, cin):
                acc = acc + x_ref[0, c, rows, :].astype(jnp.float32) * w_ref[o, c]
            # dense (rs, 128) store per output channel
            o_ref[0, o, rows, :] = (acc + b_ref[o]).astype(o_ref.dtype)
        return carry

    lax.fori_loop(0, n_strips, strip, 0)


def out_conv_block(x, weight, bias, *, max_rows_per_tile=2048):
    """1x1x1 Conv3d forward (PyTorch OutConvBlock semantics).

    x:      (N, C_in, D, H, W)
    weight: (C_out, C_in, 1, 1, 1)   (PyTorch Conv3d layout)
    bias:   (C_out,)
    returns (N, C_out, D, H, W)
    """
    N, cin, D, H, W = x.shape
    cout = weight.shape[0]
    S = D * H * W

    # ---- layout: flatten spatial, fold into lane-dense (rows, 128) slabs ----
    S_pad = ((S + _LANES - 1) // _LANES) * _LANES
    x3 = x.reshape(N, cin, S)
    if S_pad != S:
        # One-time contiguous pad so the (rows, 128) view exists; power-of-two
        # UNet shapes skip this (pure zero-copy reshape).
        x3 = jnp.pad(x3, ((0, 0), (0, 0), (0, S_pad - S)))
    Rtot = S_pad // _LANES
    x4 = x3.reshape(N, cin, Rtot, _LANES)

    w2d = weight.reshape(cout, cin).astype(jnp.float32)
    b1d = bias.reshape(cout).astype(jnp.float32)

    # ---- tile selection (rows of 128 lanes per grid step) ----
    if Rtot <= max_rows_per_tile:
        R = Rtot                                   # full extent: always legal
        if N < 2 and Rtot >= 16:
            # keep >= 2 grid steps so both v7x TensorCores get work
            R = ((pl.cdiv(Rtot, 2) + 7) // 8) * 8  # multiple of 8, < Rtot
    else:
        R = max_rows_per_tile                      # multiple of 8; last tile masked
    rs = next(c for c in (64, 32, 16, 8, 4, 2, 1) if R % c == 0)

    grid = (N, pl.cdiv(Rtot, R))

    itemsize = jnp.dtype(x.dtype).itemsize
    block_bytes = (cin + cout) * R * _LANES * max(itemsize, 4)
    vmem_limit = int(min(48 << 20, max(32 << 20, 2 * block_bytes + (8 << 20))))

    out4 = pl.pallas_call(
        functools.partial(_out_conv_kernel, cin=cin, cout=cout, rs=rs),
        out_shape=jax.ShapeDtypeStruct((N, cout, Rtot, _LANES), x.dtype),
        grid_spec=pltpu.PrefetchScalarGridSpec(
            num_scalar_prefetch=0,
            grid=grid,
            in_specs=[
                # Activations: sublane/lane-dense (1, cin, R, 128) tiles.
                pl.BlockSpec((1, cin, R, _LANES), lambda n, s: (n, 0, s, 0)),
                # Weights / bias: tiny -> whole-array SMEM residency, read as
                # scalars inside the kernel (not part of the DMA pipeline).
                pl.BlockSpec(memory_space=pltpu.MemorySpace.SMEM),
                pl.BlockSpec(memory_space=pltpu.MemorySpace.SMEM),
            ],
            out_specs=pl.BlockSpec((1, cout, R, _LANES),
                                   lambda n, s: (n, 0, s, 0)),
        ),
        compiler_params=pltpu.CompilerParams(
            dimension_semantics=("parallel", "parallel"),
            vmem_limit_bytes=vmem_limit),
        cost_estimate=pl.CostEstimate(
            flops=2 * N * cout * cin * S,
            transcendentals=0,
            bytes_accessed=(cin + cout) * N * S_pad * itemsize),
    )(x4, w2d, b1d)

    out3 = out4.reshape(N, cout, S_pad)
    if S_pad != S:
        out3 = out3[:, :, :S]
    return out3.reshape(N, cout, D, H, W)


if __name__ == "__main__":
    # Small shapes consistent with a Conv3d forward (S = 8*8*8 = 512 lanes).
    N, Cin, Cout = 2, 4, 3
    D = H = W = 8

    key = jax.random.PRNGKey(0)
    kx, kw, kb = jax.random.split(key, 3)

    x = jax.random.normal(kx, (N, Cin, D, H, W), dtype=jnp.float32)

    # Deterministic parameter init mirroring nn.Conv3d defaults
    # (kaiming-uniform-style bounds, fan_in = Cin * 1 * 1 * 1).
    fan_in = Cin
    w_bound = 1.0 / jnp.sqrt(fan_in)
    weight = jax.random.uniform(kw, (Cout, Cin, 1, 1, 1),
                                minval=-w_bound, maxval=w_bound,
                                dtype=jnp.float32)
    bias = jax.random.uniform(kb, (Cout,),
                              minval=-w_bound, maxval=w_bound,
                              dtype=jnp.float32)

    out = out_conv_block(x, weight, bias)
    out = jax.block_until_ready(out)

    # Pure-JAX reference check (1x1x1 conv == einsum over channels + bias).
    ref = jnp.einsum("ncdhw,oc->nodhw", x, weight.reshape(Cout, Cin)) \
          + bias[None, :, None, None, None]
    assert out.shape == (N, Cout, D, H, W)
    assert jnp.allclose(out, ref, atol=1e-5, rtol=1e-5)

    print("KERNEL_OK")
</pallas_src>

<mosaic_0001>
module attributes {stable_mosaic.version = 11 : i64} {
  func.func @_out_conv_kernel(%arg0: i32, %arg1: i32, %arg2: memref<1x4x4x128xf32, #tpu.memory_space<vmem>>, %arg3: memref<3x4xf32, #tpu.memory_space<smem>>, %arg4: memref<3xf32, #tpu.memory_space<smem>>, %arg5: memref<1x3x4x128xf32, #tpu.memory_space<vmem>>) attributes {dimension_semantics = [#tpu.dimension_semantics<parallel>, #tpu.dimension_semantics<parallel>], iteration_bounds = array<i64: 2, 1>, scalar_prefetch = 0 : i64, scratch_operands = 0 : i64, tpu.core_type = #tpu.core_type<tc>, window_params = [{transform_indices = @transform_0, window_bounds = array<i64: 1, 4, 4, 128>}, {transform_indices = @transform_1, window_bounds = array<i64: 3, 4>}, {transform_indices = @transform_2, window_bounds = array<i64: 3>}, {transform_indices = @transform_3, window_bounds = array<i64: 1, 3, 4, 128>}]} {
    %c0_i32 = arith.constant 0 : i32
    %c4_i32 = arith.constant 4 : i32
    %0 = arith.muli %c0_i32, %c4_i32 : i32
    %1 = tpu.assume_multiple %0, 4 : i32
    %c0 = arith.constant 0 : index
    %c0_0 = arith.constant 0 : index
    %2 = arith.index_cast %1 : i32 to index
    %c0_1 = arith.constant 0 : index
    %3 = vector.load %arg2[%c0, %c0_0, %2, %c0_1] : memref<1x4x4x128xf32, #tpu.memory_space<vmem>>, vector<1x1x4x128xf32>
    %4 = vector.shape_cast %3 : vector<1x1x4x128xf32> to vector<4x128xf32>
    %c0_2 = arith.constant 0 : index
    %c0_3 = arith.constant 0 : index
    %5 = memref.load %arg3[%c0_2, %c0_3] : memref<3x4xf32, #tpu.memory_space<smem>>
    %6 = vector.broadcast %5 : f32 to vector<4x128xf32>
    %7 = arith.mulf %4, %6 : vector<4x128xf32>
    %c0_4 = arith.constant 0 : index
    %c1 = arith.constant 1 : index
    %8 = arith.index_cast %1 : i32 to index
    %c0_5 = arith.constant 0 : index
    %9 = vector.load %arg2[%c0_4, %c1, %8, %c0_5] : memref<1x4x4x128xf32, #tpu.memory_space<vmem>>, vector<1x1x4x128xf32>
    %10 = vector.shape_cast %9 : vector<1x1x4x128xf32> to vector<4x128xf32>
    %c0_6 = arith.constant 0 : index
    %c1_7 = arith.constant 1 : index
    %11 = memref.load %arg3[%c0_6, %c1_7] : memref<3x4xf32, #tpu.memory_space<smem>>
    %12 = vector.broadcast %11 : f32 to vector<4x128xf32>
    %13 = arith.mulf %10, %12 : vector<4x128xf32>
    %14 = arith.addf %7, %13 : vector<4x128xf32>
    %c0_8 = arith.constant 0 : index
    %c2 = arith.constant 2 : index
    %15 = arith.index_cast %1 : i32 to index
    %c0_9 = arith.constant 0 : index
    %16 = vector.load %arg2[%c0_8, %c2, %15, %c0_9] : memref<1x4x4x128xf32, #tpu.memory_space<vmem>>, vector<1x1x4x128xf32>
    %17 = vector.shape_cast %16 : vector<1x1x4x128xf32> to vector<4x128xf32>
    %c0_10 = arith.constant 0 : index
    %c2_11 = arith.constant 2 : index
    %18 = memref.load %arg3[%c0_10, %c2_11] : memref<3x4xf32, #tpu.memory_space<smem>>
    %19 = vector.broadcast %18 : f32 to vector<4x128xf32>
    %20 = arith.mulf %17, %19 : vector<4x128xf32>
    %21 = arith.addf %14, %20 : vector<4x128xf32>
    %c0_12 = arith.constant 0 : index
    %c3 = arith.constant 3 : index
    %22 = arith.index_cast %1 : i32 to index
    %c0_13 = arith.constant 0 : index
    %23 = vector.load %arg2[%c0_12, %c3, %22, %c0_13] : memref<1x4x4x128xf32, #tpu.memory_space<vmem>>, vector<1x1x4x128xf32>
    %24 = vector.shape_cast %23 : vector<1x1x4x128xf32> to vector<4x128xf32>
    %c0_14 = arith.constant 0 : index
    %c3_15 = arith.constant 3 : index
    %25 = memref.load %arg3[%c0_14, %c3_15] : memref<3x4xf32, #tpu.memory_space<smem>>
    %26 = vector.broadcast %25 : f32 to vector<4x128xf32>
    %27 = arith.mulf %24, %26 : vector<4x128xf32>
    %28 = arith.addf %21, %27 : vector<4x128xf32>
    %c0_16 = arith.constant 0 : index
    %29 = memref.load %arg4[%c0_16] : memref<3xf32, #tpu.memory_space<smem>>
    %30 = vector.broadcast %29 : f32 to vector<4x128xf32>
    %31 = arith.addf %28, %30 : vector<4x128xf32>
    %c0_17 = arith.constant 0 : index
    %c0_18 = arith.constant 0 : index
    %32 = arith.index_cast %1 : i32 to index
    %c0_19 = arith.constant 0 : index
    %33 = vector.load %arg5[%c0_17, %c0_18, %32, %c0_19] : memref<1x3x4x128xf32, #tpu.memory_space<vmem>>, vector<1x1x4x128xf32>
    %34 = vector.shape_cast %33 : vector<1x1x4x128xf32> to vector<4x128xf32>
    %35 = vector.shape_cast %31 : vector<4x128xf32> to vector<1x1x4x128xf32>
    tpu.vector_store %arg5[%c0_17, %c0_18, %32, %c0_19], %35 {strides = array<i32>} : memref<1x3x4x128xf32, #tpu.memory_space<vmem>>, vector<1x1x4x128xf32>,
    %c0_20 = arith.constant 0 : index
    %c0_21 = arith.constant 0 : index
    %36 = arith.index_cast %1 : i32 to index
    %c0_22 = arith.constant 0 : index
    %37 = vector.load %arg2[%c0_20, %c0_21, %36, %c0_22] : memref<1x4x4x128xf32, #tpu.memory_space<vmem>>, vector<1x1x4x128xf32>
    %38 = vector.shape_cast %37 : vector<1x1x4x128xf32> to vector<4x128xf32>
    %c1_23 = arith.constant 1 : index
    %c0_24 = arith.constant 0 : index
    %39 = memref.load %arg3[%c1_23, %c0_24] : memref<3x4xf32, #tpu.memory_space<smem>>
    %40 = vector.broadcast %39 : f32 to vector<4x128xf32>
    %41 = arith.mulf %38, %40 : vector<4x128xf32>
    %c0_25 = arith.constant 0 : index
    %c1_26 = arith.constant 1 : index
    %42 = arith.index_cast %1 : i32 to index
    %c0_27 = arith.constant 0 : index
    %43 = vector.load %arg2[%c0_25, %c1_26, %42, %c0_27] : memref<1x4x4x128xf32, #tpu.memory_space<vmem>>, vector<1x1x4x128xf32>
    %44 = vector.shape_cast %43 : vector<1x1x4x128xf32> to vector<4x128xf32>
    %c1_28 = arith.constant 1 : index
    %c1_29 = arith.constant 1 : index
    %45 = memref.load %arg3[%c1_28, %c1_29] : memref<3x4xf32, #tpu.memory_space<smem>>
    %46 = vector.broadcast %45 : f32 to vector<4x128xf32>
    %47 = arith.mulf %44, %46 : vector<4x128xf32>
    %48 = arith.addf %41, %47 : vector<4x128xf32>
    %c0_30 = arith.constant 0 : index
    %c2_31 = arith.constant 2 : index
    %49 = arith.index_cast %1 : i32 to index
    %c0_32 = arith.constant 0 : index
    %50 = vector.load %arg2[%c0_30, %c2_31, %49, %c0_32] : memref<1x4x4x128xf32, #tpu.memory_space<vmem>>, vector<1x1x4x128xf32>
    %51 = vector.shape_cast %50 : vector<1x1x4x128xf32> to vector<4x128xf32>
    %c1_33 = arith.constant 1 : index
    %c2_34 = arith.constant 2 : index
    %52 = memref.load %arg3[%c1_33, %c2_34] : memref<3x4xf32, #tpu.memory_space<smem>>
    %53 = vector.broadcast %52 : f32 to vector<4x128xf32>
    %54 = arith.mulf %51, %53 : vector<4x128xf32>
    %55 = arith.addf %48, %54 : vector<4x128xf32>
    %c0_35 = arith.constant 0 : index
    %c3_36 = arith.constant 3 : index
    %56 = arith.index_cast %1 : i32 to index
    %c0_37 = arith.constant 0 : index
    %57 = vector.load %arg2[%c0_35, %c3_36, %56, %c0_37] : memref<1x4x4x128xf32, #tpu.memory_space<vmem>>, vector<1x1x4x128xf32>
    %58 = vector.shape_cast %57 : vector<1x1x4x128xf32> to vector<4x128xf32>
    %c1_38 = arith.constant 1 : index
    %c3_39 = arith.constant 3 : index
    %59 = memref.load %arg3[%c1_38, %c3_39] : memref<3x4xf32, #tpu.memory_space<smem>>
    %60 = vector.broadcast %59 : f32 to vector<4x128xf32>
    %61 = arith.mulf %58, %60 : vector<4x128xf32>
    %62 = arith.addf %55, %61 : vector<4x128xf32>
    %c1_40 = arith.constant 1 : index
    %63 = memref.load %arg4[%c1_40] : memref<3xf32, #tpu.memory_space<smem>>
    %64 = vector.broadcast %63 : f32 to vector<4x128xf32>
    %65 = arith.addf %62, %64 : vector<4x128xf32>
    %c0_41 = arith.constant 0 : index
    %c1_42 = arith.constant 1 : index
    %66 = arith.index_cast %1 : i32 to index
    %c0_43 = arith.constant 0 : index
    %67 = vector.load %arg5[%c0_41, %c1_42, %66, %c0_43] : memref<1x3x4x128xf32, #tpu.memory_space<vmem>>, vector<1x1x4x128xf32>
    %68 = vector.shape_cast %67 : vector<1x1x4x128xf32> to vector<4x128xf32>
    %69 = vector.shape_cast %65 : vector<4x128xf32> to vector<1x1x4x128xf32>
    tpu.vector_store %arg5[%c0_41, %c1_42, %66, %c0_43], %69 {strides = array<i32>} : memref<1x3x4x128xf32, #tpu.memory_space<vmem>>, vector<1x1x4x128xf32>,
    %c0_44 = arith.constant 0 : index
    %c0_45 = arith.constant 0 : index
    %70 = arith.index_cast %1 : i32 to index
    %c0_46 = arith.constant 0 : index
    %71 = vector.load %arg2[%c0_44, %c0_45, %70, %c0_46] : memref<1x4x4x128xf32, #tpu.memory_space<vmem>>, vector<1x1x4x128xf32>
    %72 = vector.shape_cast %71 : vector<1x1x4x128xf32> to vector<4x128xf32>
    %c2_47 = arith.constant 2 : index
    %c0_48 = arith.constant 0 : index
    %73 = memref.load %arg3[%c2_47, %c0_48] : memref<3x4xf32, #tpu.memory_space<smem>>
    %74 = vector.broadcast %73 : f32 to vector<4x128xf32>
    %75 = arith.mulf %72, %74 : vector<4x128xf32>
    %c0_49 = arith.constant 0 : index
    %c1_50 = arith.constant 1 : index
    %76 = arith.index_cast %1 : i32 to index
    %c0_51 = arith.constant 0 : index
    %77 = vector.load %arg2[%c0_49, %c1_50, %76, %c0_51] : memref<1x4x4x128xf32, #tpu.memory_space<vmem>>, vector<1x1x4x128xf32>
    %78 = vector.shape_cast %77 : vector<1x1x4x128xf32> to vector<4x128xf32>
    %c2_52 = arith.constant 2 : index
    %c1_53 = arith.constant 1 : index
    %79 = memref.load %arg3[%c2_52, %c1_53] : memref<3x4xf32, #tpu.memory_space<smem>>
    %80 = vector.broadcast %79 : f32 to vector<4x128xf32>
    %81 = arith.mulf %78, %80 : vector<4x128xf32>
    %82 = arith.addf %75, %81 : vector<4x128xf32>
    %c0_54 = arith.constant 0 : index
    %c2_55 = arith.constant 2 : index
    %83 = arith.index_cast %1 : i32 to index
    %c0_56 = arith.constant 0 : index
    %84 = vector.load %arg2[%c0_54, %c2_55, %83, %c0_56] : memref<1x4x4x128xf32, #tpu.memory_space<vmem>>, vector<1x1x4x128xf32>
    %85 = vector.shape_cast %84 : vector<1x1x4x128xf32> to vector<4x128xf32>
    %c2_57 = arith.constant 2 : index
    %c2_58 = arith.constant 2 : index
    %86 = memref.load %arg3[%c2_57, %c2_58] : memref<3x4xf32, #tpu.memory_space<smem>>
    %87 = vector.broadcast %86 : f32 to vector<4x128xf32>
    %88 = arith.mulf %85, %87 : vector<4x128xf32>
    %89 = arith.addf %82, %88 : vector<4x128xf32>
    %c0_59 = arith.constant 0 : index
    %c3_60 = arith.constant 3 : index
    %90 = arith.index_cast %1 : i32 to index
    %c0_61 = arith.constant 0 : index
    %91 = vector.load %arg2[%c0_59, %c3_60, %90, %c0_61] : memref<1x4x4x128xf32, #tpu.memory_space<vmem>>, vector<1x1x4x128xf32>
    %92 = vector.shape_cast %91 : vector<1x1x4x128xf32> to vector<4x128xf32>
    %c2_62 = arith.constant 2 : index
    %c3_63 = arith.constant 3 : index
    %93 = memref.load %arg3[%c2_62, %c3_63] : memref<3x4xf32, #tpu.memory_space<smem>>
    %94 = vector.broadcast %93 : f32 to vector<4x128xf32>
    %95 = arith.mulf %92, %94 : vector<4x128xf32>
    %96 = arith.addf %89, %95 : vector<4x128xf32>
    %c2_64 = arith.constant 2 : index
    %97 = memref.load %arg4[%c2_64] : memref<3xf32, #tpu.memory_space<smem>>
    %98 = vector.broadcast %97 : f32 to vector<4x128xf32>
    %99 = arith.addf %96, %98 : vector<4x128xf32>
    %c0_65 = arith.constant 0 : index
    %c2_66 = arith.constant 2 : index
    %100 = arith.index_cast %1 : i32 to index
    %c0_67 = arith.constant 0 : index
    %101 = vector.load %arg5[%c0_65, %c2_66, %100, %c0_67] : memref<1x3x4x128xf32, #tpu.memory_space<vmem>>, vector<1x1x4x128xf32>
    %102 = vector.shape_cast %101 : vector<1x1x4x128xf32> to vector<4x128xf32>
    %103 = vector.shape_cast %99 : vector<4x128xf32> to vector<1x1x4x128xf32>
    tpu.vector_store %arg5[%c0_65, %c2_66, %100, %c0_67], %103 {strides = array<i32>} : memref<1x3x4x128xf32, #tpu.memory_space<vmem>>, vector<1x1x4x128xf32>,
    %c1_i32 = arith.constant 1 : i32
    return
  }
  func.func @transform_0(%arg0: i32, %arg1: i32) -> (i32, i32, i32, i32) {
    %c0_i32 = arith.constant 0 : i32
    %c0_i32_0 = arith.constant 0 : i32
    %c0_i32_1 = arith.constant 0 : i32
    return %arg0, %c0_i32, %arg1, %c0_i32_0 : i32, i32, i32, i32
  }
  func.func @transform_1(%arg0: i32, %arg1: i32) -> (i32, i32) {
    %c0_i32 = arith.constant 0 : i32
    %c0_i32_0 = arith.constant 0 : i32
    %c0_i32_1 = arith.constant 0 : i32
    return %c0_i32, %c0_i32_0 : i32, i32
  }
  func.func @transform_2(%arg0: i32, %arg1: i32) -> i32 {
    %c0_i32 = arith.constant 0 : i32
    %c0_i32_0 = arith.constant 0 : i32
    return %c0_i32 : i32
  }
  func.func @transform_3(%arg0: i32, %arg1: i32) -> (i32, i32, i32, i32) {
    %c0_i32 = arith.constant 0 : i32
    %c0_i32_0 = arith.constant 0 : i32
    %c0_i32_1 = arith.constant 0 : i32
    return %arg0, %c0_i32, %arg1, %c0_i32_0 : i32, i32, i32, i32
  }
}

</mosaic_0001>

<bundles_post_ra>
// kernel: tpu_custom_call.1
= control target key start
LH: loop header
LB: loop body
LE: loop exit
PB: predicated region body
PF: predicated region fallthrough
CT: control target
= control target key end

     0   :  { %8 = vsyncpa [#allocation3], 0  ;;  %s1009_s0 = inlined_call_operand.hbm [shape: f32[2,4,4,128], index: 0, kind: input, shape index: {}]   ;;  %s1010_s1 = inlined_call_operand.hbm [shape: f32[3,4], index: 1, kind: input, shape index: {}]   ;;  %s1011_s2 = inlined_call_operand.vmem [shape: f32[3], index: 2, kind: input, shape index: {}]   ;;  %s1012_s3 = inlined_call_operand.hbm [shape: f32[2,3,4,128], index: 3, kind: output, shape index: {}]  }
   0x1   :  { %10 = vsyncpa [#allocation3 + $0x1], 0 }
   0x2   :  { %11 = vsyncpa [#allocation5], 0 }
   0x3   :  { %12 = vsyncpa [#allocation6], 0 }
   0x4   :  { %13 = vsyncpa [#allocation4], 0 }
   0x5   :  { %15 = vsyncpa [#allocation4 + $0x1], 0  ;;  %s745_s12 = smov 0   ;;  %s747_s13 = smov 0  }
   0x6   :  { %s749_s14 = smov 0   ;;  %s751_s15 = smov 0  }
   0x7   :  { %s753_s16 = smov 0   ;;  %s755_s17 = smov 0  }
   0x8 LB: > { %s437_s18 = sadd.s32 4294967295, %s715_s17   ;;  %s438_s19 = sadd.s32 4294967294, %s715_s17   ;;  %s715_s17 = sphi %s755_s17, %s21_s17   ;;  %s711_s16 = sphi %s753_s16, %s1033_s16   ;;  %s707_s15 = sphi %s751_s15, %s1032_s15   ;;  %s703_s14 = sphi %s749_s14, %s1031_s14   ;;  %s699_s13 = sphi %s747_s13, %s1030_s13   ;;  %s695_s12 = sphi %s745_s12, %s1029_s12  }
   0x9   : > { %s42_s20 = sadd.s32 1, %s703_s14  ;;  %p49_p0 = scmp.ne.s32.totalorder %s703_s14, %s699_s13 }
   0xa   : > { %p50_p1 = scmp.eq.s32.totalorder %s715_s17, 0  ;;  %p55_p2 = scmp.ne.s32.totalorder %s699_s13, %s695_s12 }
   0xb   : > { %p783_p3 = scmp.eq.s32.totalorder %s437_s18, 0  ;;  %p123_p4 = scmp.eq.s32.totalorder %s437_s18, 1 }
   0xc   : > { %p51_p5 = por %p50_p1, %p49_p0  ;;  %p129_p6 = scmp.eq.s32.totalorder %s438_s19, 1 }
   0xd   : > { %s1017_s21 = scalar_select %p783_p3, 1, 0 }
   0xe   : > { %p789_p7 = por %p783_p3, %p55_p2  ;;  %p793_p8 = por %p123_p4, %p49_p0 }
   0xf   : > { %p797_p9 = por %p129_p6, %p55_p2  ;;  %p439_p10 = scmp.ge.s32.totalorder %s715_s17, 1 }
  0x10   : > { %s1018_s22 = scalar_select %p789_p7, 1, 0 }
  0x11   : > { %s1019_s23 = scalar_select %p793_p8, 1, 0 }
  0x12   : > { %s1020_s24 = scalar_select %p797_p9, 1, 0 }
  0x13   : > { %p136_p11 = scmp.lt.s32.totalorder %s715_s17, 3  ;;  %p509_p1 = scmp.lt.s32.totalorder %s715_s17, 2 }
  0x14   : > { %s158_s28 = sshll.u32 %s1011_s2, 4  ;;  %s169_s4 = sand.u32 1, %s703_s14   ;;  %s159_s28 = int_to_ptr.vmem [resolvable:$true] %s158_s28 }
  0x15   : > { %p804_p13 = pnand %p439_p10, %p136_p11  ;;  %p814_p4 = pnand %p509_p1, %p51_p5 }
  0x16   : > { %s33_s5 = sadd.s32 1, %s711_s16  ;;  %s567_s8 = scalar_lea.hbm %s1010_s1, 64 }
  0x17   : > { %p492_p0 = pneg %p804_p13  ;;  %p568_p5 = scmp.ne.s32.totalorder %s1010_s1, %s567_s8 }
  0x18   : > { %p574_p1 = scmp.lt.u32.totalorder %s567_s8, %s1010_s1 }
  0x19   : > { %p820_p2 = pnand %p492_p0, %p783_p3 }
  0x1b   : > { %p569_p6 = pneg %p820_p2 }
  0x1d   : > { %p570_p10 = pnand %p569_p6, %p568_p5 }
  0x1f   : > { %p571_p11 = pneg %p570_p10 }
  0x21   : > { %p576_p0 = pnand %p574_p1, %p571_p11 }
  0x23   : > { %579 = shalt.err (!%p576_p0)
}
  0x24   : > { %s717_s19 = smov [#allocation7]   ;;  %s580_s6 = scalar_lea.vmem %s159_s28, 16 }
  0x25   : > { %495 = dma.hbm_to_smem (!%p820_p2), %s1010_s1, 64, %s717_s19, [#allocation5]  }
  0x26   : > { %p581_p12 = scmp.ne.s32.totalorder %s159_s28, %s580_s6  ;;  %p588_p3 = scmp.lt.s32.totalorder %s159_s28, %s159_s28 }
  0x27   : > { %p589_p5 = scmp.lt.s32.totalorder %s580_s6, %s580_s6 }
  0x28   : > { %p583_p9 = pnand %p581_p12, %p569_p6 }
  0x29   : > { %p590_p10 = por %p589_p5, %p588_p3 }
  0x2a   : > { %p584_p8 = pneg %p583_p9 }
  0x2c   : > { %p591_p7 = pnand %p590_p10, %p584_p8 }
  0x2e   : > { %594 = shalt.err (!%p591_p7)
}
  0x2f   : > { %s718_s7 = smov [#allocation8]   ;;  %p35_p11 = scmp.ge.s32.totalorder %s33_s5, 2 }
  0x30   : > { %498 = dma.vmem_to_smem (!%p820_p2), %s159_s28, 16, %s718_s7, [#allocation6]  }
  0x31   : > { %s443_s8 = sshll.u32 %s169_s4, 4  ;;  %s477_s9 = sshll.u32 %s711_s16, 8 }
  0x32   : > { %s1035_s5 = smov (%p35_p11, %s33_s5), 0  ;;  %s852_s30 = scalar_lea.hbm %s1009_s0, %s477_s9 }
  0x33   : > { %s37_s18 = ssub.s32 %s711_s16, %s1035_s5  ;;  %s173_s19 = scalar_lea.vmem [#allocation2], %s443_s8 }
  0x34   : > { %s181_s28 = sshll.u32 %s173_s19, 4  ;;  %p40_p3 = scmp.eq.s32.totalorder %s37_s18, 0  ;;  %s856_s28 = int_to_ptr.vmem [resolvable:$true] %s181_s28 }
  0x35   : > { %s865_s27 = scalar_lea.sflag [#allocation3], %s169_s4  ;;  %s595_s6 = scalar_lea.hbm %s852_s30, 256 }
  0x36   : > { %s861_s26 = scalar_select %p40_p3, %s703_s14, %s42_s20  }
  0x37   : > { %p596_p7 = scmp.ne.s32.totalorder %s852_s30, %s595_s6  ;;  %p597_p8 = pneg %p814_p4 }
  0x38   : > { %s600_s9 = scalar_lea.hbm %s1009_s0, 512  ;;  %p601_p2 = scmp.lt.u32.totalorder %s852_s30, %s1009_s0 }
  0x39   : > { %p598_p9 = pnand %p597_p8, %p596_p7  ;;  %p602_p6 = scmp.lt.u32.totalorder %s600_s9, %s595_s6 }
  0x3a   : > { %p604_p0 = scmp.lt.u32.totalorder %s595_s6, %s852_s30 }
  0x3b   : > { %p599_p12 = pneg %p598_p9  ;;  %p603_p1 = por %p602_p6, %p601_p2 }
  0x3d   : > { %p605_p5 = por %p604_p0, %p603_p1 }
  0x3f   : > { %p606_p10 = pnand %p605_p5, %p599_p12 }
  0x41   : > { %609 = shalt.err (!%p606_p10)
}
  0x42   : > { %s610_s20 = scalar_lea.vmem %s856_s28, 256  ;;  %s719_s4 = smov [#allocation2]  }
  0x43   : > { %p611_p11 = scmp.ne.s32.totalorder %s856_s28, %s610_s20  ;;  %s615_s18 = sshll.u32 %s719_s4, 4  ;;  %s616_s18 = int_to_ptr.vmem [resolvable:$false] %s615_s18 }
  0x44   : > { %s617_s19 = scalar_lea.vmem %s616_s18, 512  ;;  %p618_p9 = scmp.lt.s32.totalorder %s856_s28, %s616_s18 }
  0x45   : > { %p613_p3 = pnand %p611_p11, %p597_p8  ;;  %p619_p2 = scmp.lt.s32.totalorder %s617_s19, %s610_s20 }
  0x47   : > { %p614_p7 = pneg %p613_p3  ;;  %p620_p6 = por %p619_p2, %p618_p9 }
  0x49   : > { %p621_p1 = pnand %p620_p6, %p614_p7 }
  0x4b   : > { %624 = shalt.err (!%p621_p1)
}
  0x4c   : > { %s720_s6 = smov 64   ;;  %s721_s7 = smov 4  }
  0x4d   : > { %502 = dma.hbm_to_vmem [thread:$0]  (!%p814_p4), %s852_s30, 256, %s856_s28, %s865_s27, %s720_s6, %s720_s6, %s721_s7  }
  0x4e   : > { %193 = sbr.rel (%p804_p13) target bundleno = 131 (0x83), region = 32  ;;  %s896_s8 = sand.u32 (!%p804_p13), 1, %s699_s13  }
  0x4f   : > { %s447_s9 = sshll.u32 (!%p804_p13), %s896_s8, 4  ;;  %s196_s10 = scalar_lea.sflag (!%p804_p13), [#allocation3], %s896_s8 }
  0x50   : > { %s900_s11 = scalar_lea.vmem (!%p804_p13), [#allocation2], %s447_s9  ;;  %p1024_p8 = scmp.ne.s32.totalorder (!%p804_p13), %s1018_s22, 0 }
  0x55   : > { %678 = dma.done.wait (%p1024_p8), %s196_s10, 256  }
  0x56   : > { %680 = vsyncadd (%p1024_p8), %s196_s10, 4294967040  ;;  %p1025_p4 = scmp.ne.s32.totalorder %s1017_s21, 0 }
  0x58   : > { %682 = dma.done.wait (%p1025_p4), [#allocation5], 64  }
  0x59   : > { %684 = vsyncadd (%p1025_p4), [#allocation5], 4294967232 }
  0x5a   : > { %686 = dma.done.wait (%p1025_p4), [#allocation6], 16  }
  0x5b   : > { %688 = vsyncadd (%p1025_p4), [#allocation6], 4294967280 }
  0x5c   : > { %212 = sfence }
  0x5d   : > { %s232_s25 = sld [smem:[#allocation7]]  ;;  %s451_s22 = sld [smem:[#allocation7 + $0x1]]  ;;  %v231_v0 = vld [vmem:[%s900_s11] sm:$0xf]  ;;  %v450_v1 = vld [vmem:[%s900_s11 + $0x4] sm:$0xf] }
  0x5e   : > { %s453_s29 = sld [smem:[#allocation7 + $0x2]]  ;;  %s455_s30 = sld [smem:[#allocation7 + $0x3]]  ;;  %v452_v3 = vld [vmem:[%s900_s11 + $0x8] sm:$0xf]  ;;  %v454_v6 = vld [vmem:[%s900_s11 + $0xc] sm:$0xf] }
  0x5f   : > { %s456_s28 = sld [smem:[#allocation7 + $0x80]]  ;;  %s458_s20 = sld [smem:[#allocation7 + $0x81]]  ;;  %v260_v9 = vld [vmem:[%s900_s11] sm:$0xf]  ;;  %v457_v12 = vld [vmem:[%s900_s11 + $0x4] sm:$0xf] }
  0x60   : > { %s916_s27 = sld [smem:[#allocation8]]  ;;  %s919_s21 = sld [smem:[#allocation7 + $0x82]]  ;;  %v459_v16 = vld [vmem:[%s900_s11 + $0x8] sm:$0xf]  ;;  %v461_v17 = vld [vmem:[%s900_s11 + $0xc] sm:$0xf] }
  0x61   : > { %s921_s4 = sld [smem:[#allocation7 + $0x83]]  ;;  %s924_s18 = sld [smem:[#allocation7 + $0x100]]  ;;  %v284_v20 = vld [vmem:[%s900_s11] sm:$0xf]  ;;  %v466_v25 = vld [vmem:[%s900_s11 + $0x4] sm:$0xf] }
  0x62   : > { %s927_s19 = sld [smem:[#allocation7 + $0x101]]  ;;  %s929_s6 = sld [smem:[#allocation7 + $0x102]]  ;;  %v468_v30 = vld [vmem:[%s900_s11 + $0x8] sm:$0xf]  ;;  %v470_v35 = vld [vmem:[%s900_s11 + $0xc] sm:$0xf] }
  0x63   : > { %v233_v2 = vstv %s232_s25  ;;  %v239_v5 = vstv %s451_s22  ;;  %s932_s7 = sld [smem:[#allocation8 + $0x1]]  ;;  %s934_s9 = sld [smem:[#allocation7 + $0x103]] }
  0x64   : > { %v234_v4 = vmul.f32 %v233_v2, %v231_v0  ;;  %v240_v7 = vmul.f32 %v450_v1, %v239_v5  ;;  %v246_v8 = vstv %s453_s29  ;;  %v253_v11 = vstv %s455_s30  ;;  %s478_s10 = smul.u32 12, %s896_s8  ;;  %s943_s25 = sld [smem:[#allocation8 + $0x2]] }
  0x65   : > { %v247_v10 = vmul.f32 %v452_v3, %v246_v8  ;;  %v254_v14 = vmul.f32 %v454_v6, %v253_v11  ;;  %v262_v15 = vstv %s456_s28  ;;  %v266_v19 = vstv %s458_s20  ;;  %s479_s30 = smul.u32 192, %s707_s15  ;;  %s309_s20 = scalar_lea.sflag [#allocation4], %s896_s8 }
  0x66   : > { %v241_v13 = vadd.f32 %v240_v7, %v234_v4  ;;  %v263_v18 = vmul.f32 %v262_v15, %v260_v9  ;;  %v267_v22 = vmul.f32 %v457_v12, %v266_v19  ;;  %v271_v23 = vstv %s919_s21  ;;  %s230_s22 = scalar_lea.vmem [#allocation9], %s478_s10  ;;  %p1026_p12 = scmp.ne.s32.totalorder %s1019_s23, 0 }
  0x67   : > { %v276_v24 = vstv %s921_s4  ;;  %v257_v26 = vstv %s916_s27  ;;  %v272_v27 = vmul.f32 %v459_v16, %v271_v23  ;;  %v286_v29 = vstv %s924_s18  ;;  %s323_s29 = sshll.u32 %s230_s22, 4  ;;  %s960_s27 = scalar_lea.hbm %s1012_s3, %s479_s30  ;;  %s955_s29 = int_to_ptr.vmem [resolvable:$true] %s323_s29 }
  0x68   : > { %v248_v21 = vadd.f32 %v247_v10, %v241_v13  ;;  %v277_v28 = vmul.f32 %v461_v17, %v276_v24  ;;  %v268_v32 = vadd.f32 %v267_v22, %v263_v18  ;;  %v287_v33 = vmul.f32 %v286_v29, %v284_v20  ;;  %s625_s21 = scalar_lea.vmem %s955_s29, 192  ;;  %s722_s15 = smov [#allocation9]  }
  0x69   : > { %v290_v34 = vstv %s927_s19  ;;  %v295_v37 = vstv %s929_s6  ;;  %v300_v38 = vstv %s934_s9  ;;  %v280_v42 = vstv %s932_s7  ;;  %p626_p13 = scmp.ne.s32.totalorder %s955_s29, %s625_s21  ;;  %s629_s4 = sshll.u32 %s722_s15, 4  ;;  %s630_s4 = int_to_ptr.vmem [resolvable:$false] %s629_s4 }
  0x6a   : > { %v255_v31 = vadd.f32 %v254_v14, %v248_v21  ;;  %v291_v36 = vmul.f32 %v466_v25, %v290_v34  ;;  %v273_v40 = vadd.f32 %v272_v27, %v268_v32  ;;  %v296_v41 = vmul.f32 %v468_v30, %v295_v37  ;;  %s631_s18 = scalar_lea.vmem %s630_s4, 384  ;;  %p632_p10 = scmp.lt.s32.totalorder %s955_s29, %s630_s4 }
  0x6b   : > { %v301_v44 = vmul.f32 %v470_v35, %v300_v38  ;;  %v304_v48 = vstv %s943_s25  ;;  %p627_p0 = pnand %p626_p13, %p1026_p12  ;;  %p633_p11 = scmp.lt.s32.totalorder %s631_s18, %s625_s21 }
  0x6c   : > { %v258_v39 = vadd.f32 %v257_v26, %v255_v31  ;;  %v292_v43 = vadd.f32 %v291_v36, %v287_v33  ;;  %v278_v45 = vadd.f32 %v277_v28, %v273_v40 }
  0x6d   : > { %p628_p5 = pneg %p627_p0  ;;  %p634_p3 = por %p633_p11, %p632_p10 }
  0x6e   : > { %259 = vst [vmem:[%s230_s22] sm:$0xf] %v258_v39  ;;  %v297_v46 = vadd.f32 %v296_v41, %v292_v43  ;;  %v281_v47 = vadd.f32 %v280_v42, %v278_v45 }
  0x6f   : > { %p635_p7 = pnand %p634_p3, %p628_p5 }
  0x70   : > { %v302_v49 = vadd.f32 %v301_v44, %v297_v46  ;;  %464 = vst [vmem:[%s230_s22 + $0x4] sm:$0xf] %v281_v47 }
  0x72   : > { %v305_v50 = vadd.f32 %v304_v48, %v302_v49 }
  0x74   : > { %473 = vst [vmem:[%s230_s22 + $0x8] sm:$0xf] %v305_v50 }
  0x75   : > { %638 = shalt.err (!%p635_p7)
}
  0x76   : > { %s639_s19 = scalar_lea.hbm %s960_s27, 192  ;;  %s643_s9 = scalar_lea.hbm %s1012_s3, 384 }
  0x77   : > { %p640_p9 = scmp.ne.s32.totalorder %s960_s27, %s639_s19  ;;  %p644_p1 = scmp.lt.u32.totalorder %s960_s27, %s1012_s3 }
  0x78   : > { %p645_p8 = scmp.lt.u32.totalorder %s643_s9, %s639_s19  ;;  %p647_p13 = scmp.lt.u32.totalorder %s639_s19, %s960_s27 }
  0x79   : > { %p641_p2 = pnand %p640_p9, %p1026_p12 }
  0x7a   : > { %p646_p4 = por %p645_p8, %p644_p1 }
  0x7b   : > { %p642_p6 = pneg %p641_p2 }
  0x7c   : > { %p648_p0 = por %p647_p13, %p646_p4 }
  0x7e   : > { %p649_p5 = pnand %p648_p0, %p642_p6 }
  0x80   : > { %652 = shalt.err (!%p649_p5)
}
  0x81   : > { %s723_s22 = smov 64   ;;  %s724_s30 = smov 4  }
  0x82   : > { %490 = dma.vmem_to_hbm [thread:$0]  (%p1026_p12), %s955_s29, 192, %s960_s27, %s309_s20, %s723_s22, %s723_s22, %s724_s30  }
  0x83 PF: > { %s338_s11 = sand.u32 1, %s695_s12   ;;  %p1027_p10 = scmp.ne.s32.totalorder %s1020_s24, 0 }
  0x84   : > { %p1028_p11 = scmp.ge.s32.totalorder %s715_s17, 2  ;;  %s339_s28 = scalar_lea.sflag [#allocation4], %s338_s11 }
  0x86   : > { %p504_p3 = pnand %p1028_p11, %p1027_p10 }
  0x88   : > { %690 = dma.done.wait (!%p504_p3), %s339_s28, 192  }
  0x89   : > { %692 = vsyncadd (!%p504_p3), %s339_s28, 4294967104  ;;  %s21_s17 = sadd.s32 1, %s715_s17   ;;  %s1029_s12 = smov %s699_s13 }
  0x8a   : > { %p18_p7 = scmp.ge.s32.totalorder %s21_s17, 4   ;;  %s1030_s13 = smov %s703_s14 }
  0x8b   : > { %s1031_s14 = smov %s861_s26  ;;  %s1032_s15 = smov %s711_s16 }
  0x8c   : > { %s1033_s16 = smov %s1035_s5  ;;  %20 = sbr.rel (!%p18_p7) target bundleno = 8 (0x8), region = 92 }
  0x93   :  { %344 = vsyncpa [#allocation3], 1 }
  0x94   :  { %346 = vsyncpa [#allocation3 + $0x1], 1 }
  0x95   :  { %347 = vsyncpa [#allocation4], 1 }
  0x96   :  { %349 = vsyncpa [#allocation4 + $0x1], 1 }
  0x97   :  { %350 = vsyncpa [#allocation5], 1 }
  0x98   :  { %352 = vsyncpa [#allocation5 + $0x1], 1 }
  0x99   :  { %353 = vsyncpa [#allocation6], 1 }
  0x9a   :  { %355 = vsyncpa [#allocation6 + $0x1], 1 }

</bundles_post_ra>
